<compile_context>
chip_gen: v7x
topology: tpu7x:2x2x1
jax: 0.10.0
libtpu: 0.0.40
codegen_flags: <defaults>
</compile_context>

<pallas_src>
import functools

import jax
import jax.numpy as jnp
import numpy as np
from jax import lax
from jax.experimental import pallas as pl
from jax.experimental.pallas import tpu as pltpu


def _downsample_kernel(xs_ref, w_ref, b_ref, o_ref, *, TH, Wo, C4, Cout):
    """One (batch, row-tile) of the 4x4/stride-2 conv, phrased as a 2x2/stride-1 conv.

    xs_ref : (1, TH+1, Wo+1, C4)  bf16   space-to-depth'd, pre-padded input tile (halo included)
    w_ref  : (2, 2, C4, Cout)     bf16   rearranged weights (tap-major, matches xs packing)
    b_ref  : (1, Cout)            f32    bias
    o_ref  : (1, TH, Wo, Cout)           output tile (NHWC)
    """
    acc = jnp.zeros((TH * Wo, Cout), jnp.float32)
    # 4 tap matmuls with K = 4*Cin each (vs 16 taps with K = Cin naively), accumulated in
    # f32.  dy indexes an outer (vreg-crossing) dim -> free; dx=1 is a one-sublane shift
    # handled by the XLU slot.
    for dy in range(2):
        for dx in range(2):
            patch = xs_ref[0, dy:dy + TH, dx:dx + Wo, :].reshape(TH * Wo, C4)
            acc = acc + jnp.dot(patch, w_ref[dy, dx, :, :],
                                preferred_element_type=jnp.float32)
    out = acc + b_ref[...]                                    # bias add, f32 epilogue
    # (TH*Wo, Cout) -> (TH, Wo, Cout) is layout-trivial when Wo is a multiple of 8.
    o_ref[0] = out.reshape(TH, Wo, Cout).astype(o_ref.dtype)


def _pick_row_tiles(N, Ho, Wo, C4, Cout, in_itemsize, out_itemsize,
                    vmem_budget=8 * 1024 * 1024):
    """Fewest row tiles such that double-buffered tiles fit VMEM and grid >= 2 (megacore)."""
    best = 1
    for n_ht in range(1, Ho + 1):
        if Ho % n_ht:
            continue
        th = Ho // n_ht
        xs_tile = (th + 1) * (Wo + 1) * C4 * in_itemsize
        out_tile = th * Wo * Cout * out_itemsize
        fits = 2 * (xs_tile + out_tile) <= vmem_budget         # double-buffered in/out
        if fits and N * n_ht >= 2:
            return n_ht
        best = n_ht
    # TODO(synk): if even single-row tiles overflow VMEM (huge W*Cin*Cout), also tile Wo/Cout.
    return best


def downsample(x, w, b, *, compute_dtype=jnp.bfloat16, row_tiles=None):
    """Forward of Downsample: Conv2d(Cin, Cout, kernel_size=4, stride=2, padding=1), NCHW."""
    N, Cin, H, W = x.shape
    Cout, Cin_w, KH, KW = w.shape
    assert (KH, KW) == (4, 4) and Cin_w == Cin
    assert H % 2 == 0 and W % 2 == 0, "stride-2 downsample expects even spatial dims"
    Ho, Wo, C4 = H // 2, W // 2, 4 * Cin

    in_itemsize = jnp.dtype(compute_dtype).itemsize
    out_itemsize = jnp.dtype(x.dtype).itemsize
    if row_tiles is None:
        row_tiles = _pick_row_tiles(N, Ho, Wo, C4, Cout, in_itemsize, out_itemsize)
    assert Ho % row_tiles == 0, "row_tiles must divide Ho"
    TH = Ho // row_tiles
    G = N * row_tiles

    # ---- wrapper glue (fuses into one XLA copy): NCHW -> pad(1) -> NHWC -> space-to-depth.
    xp = jnp.pad(x, ((0, 0), (0, 0), (1, 1), (1, 1)))                   # (N, Cin, H+2, W+2)
    xp = jnp.transpose(xp, (0, 2, 3, 1))                                # (N, H+2, W+2, Cin)
    xs = xp.reshape(N, Ho + 1, 2, Wo + 1, 2, Cin)
    xs = jnp.transpose(xs, (0, 1, 3, 2, 4, 5)).reshape(N, Ho + 1, Wo + 1, C4)
    xs = xs.astype(compute_dtype)

    # Bake the 1-row halo into each row tile (overlapping slices), then fold the tile axis
    # into the batch axis so the kernel/grid is a plain 1-D "parallel" sweep.
    if row_tiles == 1:
        xs_t = xs                                                       # (G, Ho+1, Wo+1, C4)
    else:
        xs_t = jnp.stack(
            [xs[:, t * TH: t * TH + TH + 1] for t in range(row_tiles)], axis=1)
        xs_t = xs_t.reshape(G, TH + 1, Wo + 1, C4)

    # OIHW -> HWIO -> (dy, dx, p*2*Cin + q*Cin + c, Cout) to match the xs channel packing.
    wh = jnp.transpose(w, (2, 3, 1, 0))                                 # (4, 4, Cin, Cout)
    wz = jnp.transpose(wh.reshape(2, 2, 2, 2, Cin, Cout), (0, 2, 1, 3, 4, 5))
    wz = wz.reshape(2, 2, C4, Cout).astype(compute_dtype)
    bz = b.reshape(1, Cout).astype(jnp.float32)

    kernel = functools.partial(_downsample_kernel, TH=TH, Wo=Wo, C4=C4, Cout=Cout)

    flops = 2 * N * Ho * Wo * (16 * Cin) * Cout
    bytes_accessed = (xs_t.size * in_itemsize + wz.size * in_itemsize
                      + bz.size * 4 + N * Ho * Wo * Cout * out_itemsize)

    out_t = pl.pallas_call(
        kernel,
        out_shape=jax.ShapeDtypeStruct((G, TH, Wo, Cout), x.dtype),
        grid=(G,),
        in_specs=[
            pl.BlockSpec((1, TH + 1, Wo + 1, C4), lambda g: (g, 0, 0, 0)),
            pl.BlockSpec((2, 2, C4, Cout), lambda g: (0, 0, 0, 0)),      # fetched once
            pl.BlockSpec((1, Cout), lambda g: (0, 0)),
        ],
        out_specs=pl.BlockSpec((1, TH, Wo, Cout), lambda g: (g, 0, 0, 0)),
        compiler_params=pltpu.CompilerParams(dimension_semantics=("parallel",)),
        cost_estimate=pl.CostEstimate(flops=flops, transcendentals=0,
                                      bytes_accessed=bytes_accessed),
    )(xs_t, wz, bz)

    out_nhwc = out_t.reshape(N, Ho, Wo, Cout)
    return jnp.transpose(out_nhwc, (0, 3, 1, 2))                        # back to NCHW


if __name__ == "__main__":
    N, Cin, H, W = 2, 4, 16, 16
    Cout = 64

    key = jax.random.PRNGKey(0)
    kx, kw, kb = jax.random.split(key, 3)
    x = jax.random.normal(kx, (N, Cin, H, W), jnp.float32)
    w = 0.05 * jax.random.normal(kw, (Cout, Cin, 4, 4), jnp.float32)     # OIHW, like PyTorch
    b = 0.1 * jax.random.normal(kb, (Cout,), jnp.float32)                # Conv2d default bias=True

    # pure-JAX reference of the same forward (cross-correlation, stride 2, pad 1, + bias)
    ref = lax.conv_general_dilated(
        x, w, window_strides=(2, 2), padding=((1, 1), (1, 1)),
        dimension_numbers=("NCHW", "OIHW", "NCHW")) + b.reshape(1, Cout, 1, 1)

    # default (auto-picked tiling: whole image per grid step at these sizes)
    out = jax.block_until_ready(downsample(x, w, b))
    assert out.shape == (N, Cout, H // 2, W // 2)
    np.testing.assert_allclose(np.asarray(out), np.asarray(ref), atol=3e-2, rtol=3e-2)

    # also exercise the row-tiled (halo-duplicated) path used for N==1 / large images
    out2 = jax.block_until_ready(downsample(x, w, b, row_tiles=2))
    np.testing.assert_allclose(np.asarray(out2), np.asarray(ref), atol=3e-2, rtol=3e-2)

    print("KERNEL_OK")
</pallas_src>

<mosaic_0001>
module attributes {stable_mosaic.version = 11 : i64} {
  func.func @_downsample_kernel(%arg0: i32, %arg1: memref<1x9x9x16xbf16, #tpu.memory_space<vmem>>, %arg2: memref<2x2x16x64xbf16, #tpu.memory_space<vmem>>, %arg3: memref<1x64xf32, #tpu.memory_space<vmem>>, %arg4: memref<1x8x8x64xf32, #tpu.memory_space<vmem>>) attributes {dimension_semantics = [#tpu.dimension_semantics<parallel>], iteration_bounds = array<i64: 2>, scalar_prefetch = 0 : i64, scratch_operands = 0 : i64, tpu.core_type = #tpu.core_type<tc>, window_params = [{transform_indices = @transform_0, window_bounds = array<i64: 1, 9, 9, 16>}, {pipeline_mode = #tpu.pipeline_mode<synchronous>, transform_indices = @transform_1, window_bounds = array<i64: 2, 2, 16, 64>}, {pipeline_mode = #tpu.pipeline_mode<synchronous>, transform_indices = @transform_2, window_bounds = array<i64: 1, 64>}, {transform_indices = @transform_3, window_bounds = array<i64: 1, 8, 8, 64>}]} {
    %cst = arith.constant 0.000000e+00 : f32
    %0 = vector.broadcast %cst : f32 to vector<64x64xf32>
    %c0 = arith.constant 0 : index
    %c0_0 = arith.constant 0 : index
    %c0_1 = arith.constant 0 : index
    %c0_2 = arith.constant 0 : index
    %1 = vector.load %arg1[%c0, %c0_0, %c0_1, %c0_2] : memref<1x9x9x16xbf16, #tpu.memory_space<vmem>>, vector<1x8x8x16xbf16>
    %2 = vector.shape_cast %1 : vector<1x8x8x16xbf16> to vector<8x8x16xbf16>
    %3 = vector.shape_cast %2 : vector<8x8x16xbf16> to vector<64x16xbf16>
    %c0_3 = arith.constant 0 : index
    %c0_4 = arith.constant 0 : index
    %c0_5 = arith.constant 0 : index
    %c0_6 = arith.constant 0 : index
    %4 = vector.load %arg2[%c0_3, %c0_4, %c0_5, %c0_6] : memref<2x2x16x64xbf16, #tpu.memory_space<vmem>>, vector<1x1x16x64xbf16>
    %5 = vector.shape_cast %4 : vector<1x1x16x64xbf16> to vector<16x64xbf16>
    %cst_7 = arith.constant dense<0.000000e+00> : vector<64x64xf32>
    %6 = tpu.matmul %3, %5, %cst_7 {dimension_numbers = #tpu.dot_dimension_numbers<[1], [0], [0], [1], [0, 0, 1, 1], [], []>} : vector<64x16xbf16>, vector<16x64xbf16>, vector<64x64xf32> -> vector<64x64xf32>
    %7 = arith.addf %0, %6 : vector<64x64xf32>
    %c0_8 = arith.constant 0 : index
    %c0_9 = arith.constant 0 : index
    %c1 = arith.constant 1 : index
    %c0_10 = arith.constant 0 : index
    %8 = vector.load %arg1[%c0_8, %c0_9, %c1, %c0_10] : memref<1x9x9x16xbf16, #tpu.memory_space<vmem>>, vector<1x8x8x16xbf16>
    %9 = vector.shape_cast %8 : vector<1x8x8x16xbf16> to vector<8x8x16xbf16>
    %10 = vector.shape_cast %9 : vector<8x8x16xbf16> to vector<64x16xbf16>
    %c0_11 = arith.constant 0 : index
    %c1_12 = arith.constant 1 : index
    %c0_13 = arith.constant 0 : index
    %c0_14 = arith.constant 0 : index
    %11 = vector.load %arg2[%c0_11, %c1_12, %c0_13, %c0_14] : memref<2x2x16x64xbf16, #tpu.memory_space<vmem>>, vector<1x1x16x64xbf16>
    %12 = vector.shape_cast %11 : vector<1x1x16x64xbf16> to vector<16x64xbf16>
    %cst_15 = arith.constant dense<0.000000e+00> : vector<64x64xf32>
    %13 = tpu.matmul %10, %12, %cst_15 {dimension_numbers = #tpu.dot_dimension_numbers<[1], [0], [0], [1], [0, 0, 1, 1], [], []>} : vector<64x16xbf16>, vector<16x64xbf16>, vector<64x64xf32> -> vector<64x64xf32>
    %14 = arith.addf %7, %13 : vector<64x64xf32>
    %c0_16 = arith.constant 0 : index
    %c1_17 = arith.constant 1 : index
    %c0_18 = arith.constant 0 : index
    %c0_19 = arith.constant 0 : index
    %15 = vector.load %arg1[%c0_16, %c1_17, %c0_18, %c0_19] : memref<1x9x9x16xbf16, #tpu.memory_space<vmem>>, vector<1x8x8x16xbf16>
    %16 = vector.shape_cast %15 : vector<1x8x8x16xbf16> to vector<8x8x16xbf16>
    %17 = vector.shape_cast %16 : vector<8x8x16xbf16> to vector<64x16xbf16>
    %c1_20 = arith.constant 1 : index
    %c0_21 = arith.constant 0 : index
    %c0_22 = arith.constant 0 : index
    %c0_23 = arith.constant 0 : index
    %18 = vector.load %arg2[%c1_20, %c0_21, %c0_22, %c0_23] : memref<2x2x16x64xbf16, #tpu.memory_space<vmem>>, vector<1x1x16x64xbf16>
    %19 = vector.shape_cast %18 : vector<1x1x16x64xbf16> to vector<16x64xbf16>
    %cst_24 = arith.constant dense<0.000000e+00> : vector<64x64xf32>
    %20 = tpu.matmul %17, %19, %cst_24 {dimension_numbers = #tpu.dot_dimension_numbers<[1], [0], [0], [1], [0, 0, 1, 1], [], []>} : vector<64x16xbf16>, vector<16x64xbf16>, vector<64x64xf32> -> vector<64x64xf32>
    %21 = arith.addf %14, %20 : vector<64x64xf32>
    %c0_25 = arith.constant 0 : index
    %c1_26 = arith.constant 1 : index
    %c1_27 = arith.constant 1 : index
    %c0_28 = arith.constant 0 : index
    %22 = vector.load %arg1[%c0_25, %c1_26, %c1_27, %c0_28] : memref<1x9x9x16xbf16, #tpu.memory_space<vmem>>, vector<1x8x8x16xbf16>
    %23 = vector.shape_cast %22 : vector<1x8x8x16xbf16> to vector<8x8x16xbf16>
    %24 = vector.shape_cast %23 : vector<8x8x16xbf16> to vector<64x16xbf16>
    %c1_29 = arith.constant 1 : index
    %c1_30 = arith.constant 1 : index
    %c0_31 = arith.constant 0 : index
    %c0_32 = arith.constant 0 : index
    %25 = vector.load %arg2[%c1_29, %c1_30, %c0_31, %c0_32] : memref<2x2x16x64xbf16, #tpu.memory_space<vmem>>, vector<1x1x16x64xbf16>
    %26 = vector.shape_cast %25 : vector<1x1x16x64xbf16> to vector<16x64xbf16>
    %cst_33 = arith.constant dense<0.000000e+00> : vector<64x64xf32>
    %27 = tpu.matmul %24, %26, %cst_33 {dimension_numbers = #tpu.dot_dimension_numbers<[1], [0], [0], [1], [0, 0, 1, 1], [], []>} : vector<64x16xbf16>, vector<16x64xbf16>, vector<64x64xf32> -> vector<64x64xf32>
    %28 = arith.addf %21, %27 : vector<64x64xf32>
    %c0_34 = arith.constant 0 : index
    %c0_35 = arith.constant 0 : index
    %29 = vector.load %arg3[%c0_34, %c0_35] : memref<1x64xf32, #tpu.memory_space<vmem>>, vector<1x64xf32>
    %30 = vector.broadcast %29 : vector<1x64xf32> to vector<64x64xf32>
    %31 = arith.addf %28, %30 : vector<64x64xf32>
    %32 = vector.shape_cast %31 : vector<64x64xf32> to vector<8x8x64xf32>
    %c0_36 = arith.constant 0 : index
    %c0_37 = arith.constant 0 : index
    %c0_38 = arith.constant 0 : index
    %c0_39 = arith.constant 0 : index
    %33 = vector.load %arg4[%c0_36, %c0_37, %c0_38, %c0_39] : memref<1x8x8x64xf32, #tpu.memory_space<vmem>>, vector<1x8x8x64xf32>
    %34 = vector.shape_cast %33 : vector<1x8x8x64xf32> to vector<8x8x64xf32>
    %35 = vector.shape_cast %32 : vector<8x8x64xf32> to vector<1x8x8x64xf32>
    tpu.vector_store %arg4[%c0_36, %c0_37, %c0_38, %c0_39], %35 {strides = array<i32>} : memref<1x8x8x64xf32, #tpu.memory_space<vmem>>, vector<1x8x8x64xf32>,
    return
  }
  func.func @transform_0(%arg0: i32) -> (i32, i32, i32, i32) {
    %c0_i32 = arith.constant 0 : i32
    %c0_i32_0 = arith.constant 0 : i32
    %c0_i32_1 = arith.constant 0 : i32
    %c0_i32_2 = arith.constant 0 : i32
    return %arg0, %c0_i32, %c0_i32_0, %c0_i32_1 : i32, i32, i32, i32
  }
  func.func @transform_1(%arg0: i32) -> (i32, i32, i32, i32) {
    %c0_i32 = arith.constant 0 : i32
    %c0_i32_0 = arith.constant 0 : i32
    %c0_i32_1 = arith.constant 0 : i32
    %c0_i32_2 = arith.constant 0 : i32
    %c0_i32_3 = arith.constant 0 : i32
    return %c0_i32, %c0_i32_0, %c0_i32_1, %c0_i32_2 : i32, i32, i32, i32
  }
  func.func @transform_2(%arg0: i32) -> (i32, i32) {
    %c0_i32 = arith.constant 0 : i32
    %c0_i32_0 = arith.constant 0 : i32
    %c0_i32_1 = arith.constant 0 : i32
    return %c0_i32, %c0_i32_0 : i32, i32
  }
  func.func @transform_3(%arg0: i32) -> (i32, i32, i32, i32) {
    %c0_i32 = arith.constant 0 : i32
    %c0_i32_0 = arith.constant 0 : i32
    %c0_i32_1 = arith.constant 0 : i32
    %c0_i32_2 = arith.constant 0 : i32
    return %arg0, %c0_i32, %c0_i32_0, %c0_i32_1 : i32, i32, i32, i32
  }
}

</mosaic_0001>

<bundles_post_ra>
// kernel: tpu_custom_call.1
= control target key start
LH: loop header
LB: loop body
LE: loop exit
PB: predicated region body
PF: predicated region fallthrough
CT: control target
= control target key end

     0   :  { %8 = vsyncpa [#allocation3], 0  ;;  %s1532_s0 = inlined_call_operand.vmem [shape: bf16[2,9,9,16], index: 0, kind: input, shape index: {}]   ;;  %s1533_s1 = inlined_call_operand.vmem [shape: bf16[2,2,16,64], index: 1, kind: input, shape index: {}]   ;;  %s1534_s2 = inlined_call_operand.vmem [shape: f32[1,64], index: 2, kind: input, shape index: {}]   ;;  %s1535_s3 = inlined_call_operand.hbm [shape: f32[2,8,8,64], index: 3, kind: output, shape index: {}]  }
   0x1   :  { %10 = vsyncpa [#allocation3 + $0x1], 0  ;;  %s1266_s12 = smov 0   ;;  %s1268_s13 = smov 0  }
   0x2   :  { %s1270_s14 = smov 0   ;;  %s1272_s15 = smov 0  }
   0x3 LB: > { %s1287_s16 = sadd.s32 4294967295, %s1241_s15   ;;  %s962_s17 = sadd.s32 4294967294, %s1241_s15   ;;  %s1241_s15 = sphi %s1272_s15, %s1543_s15   ;;  %s1237_s14 = sphi %s1270_s14, %s1542_s14   ;;  %s1233_s13 = sphi %s1268_s13, %s1541_s13   ;;  %s1229_s12 = sphi %s1266_s12, %s1540_s12  }
   0x4   : > { %s1291_s18 = sadd.s32 1, %s1241_s15   ;;  %s91_s19 = sadd.s32 1, %s1237_s14 }
   0x5   : > { %s88_s20 = ssub.s32 %s1241_s15, %s1291_s18  ;;  %p101_p0 = scmp.ne.s32.totalorder %s1237_s14, %s1233_s13 }
   0x6   : > { %p89_p1 = scmp.eq.s32.totalorder %s88_s20, 0  ;;  %p102_p2 = scmp.eq.s32.totalorder %s1287_s16, 1 }
   0x7   : > { %p107_p3 = scmp.ne.s32.totalorder %s1233_s13, %s1229_s12  ;;  %p108_p4 = scmp.eq.s32.totalorder %s962_s17, 1 }
   0x8   : > { %s1302_s21 = scalar_select %p89_p1, %s1237_s14, %s91_s19  }
   0x9   : > { %p1304_p5 = por %p102_p2, %p101_p0  ;;  %p1308_p6 = por %p108_p4, %p107_p3 }
   0xa   : > { %p965_p7 = scmp.ge.s32.totalorder %s1241_s15, 1  ;;  %p140_p8 = scmp.lt.s32.totalorder %s1241_s15, 3 }
   0xc   : > { %p141_p9 = pnand %p965_p7, %p140_p8 }
   0xd   : > { %v1167_v0 = vld [vmem:[%s1533_s1 + $0x10] sm:$0xff] (!%p141_p9)   ;;  %p164_p10 = scmp.lt.s32.totalorder (!%p141_p9), %s1287_s16, 1  ;;  %v1170_v1 = vld [vmem:[%s1533_s1 + $0x8] sm:$0xff] (!%p141_p9)   ;;  %v1325_v2 = vld [vmem:[%s1533_s1] sm:$0xff] (!%p141_p9)   ;;  %vm324_vm0 = vcmask (!%p141_p9), 130048   ;;  %s161_s10 = sand.u32 (!%p141_p9), 1, %s1233_s13  }
   0xe   : > { %144 = sbr.rel (%p141_p9) target bundleno = 315 (0x13b), region = 32  ;;  %1081 = vmatprep.subr.bf16.mxu0 (!%p141_p9), %v1167_v0  ;;  %1061 = vmatprep.subr.bf16.mxu1 (!%p141_p9), %v1170_v1  ;;  %v1174_v3 = vld [vmem:[%s1533_s1 + $0x18] sm:$0xff] (!%p141_p9)   ;;  %vm188_vm1 = vsmask.f32 (!%p141_p9), 3328  ;;  %vm189_vm2 = vsmask.f32 (!%p141_p9), 7440 }
   0xf   : > { %1082 = vmatpush3.bf16.msra.mxu0 (!%p141_p9), %v1167_v0  ;;  %1062 = vmatpush3.bf16.msra.mxu1 (!%p141_p9), %v1170_v1  ;;  %vm1367_vm3 = vmor (!%p141_p9), %vm188_vm1, %vm189_vm2  ;;  %s966_s11 = sshll.u32 (!%p141_p9), %s161_s10, 6  ;;  %vm877_vm4 = vcmask (!%p141_p9), 523264   ;;  %s1040_s24 = sshll.u32 (!%p141_p9), %s1287_s16, 10 }
  0x10   : > { %1071 = vmatprep.subr.bf16.mxu1 (!%p141_p9), %v1325_v2  ;;  %1091 = vmatprep.subr.bf16.mxu0 (!%p141_p9), %v1174_v3  ;;  %s163_s20 = scalar_lea.vmem (!%p141_p9), [#allocation2], %s966_s11  ;;  %s1243_s30 = smov (!%p141_p9), [#allocation2]  }
  0x11   : > { %s900_s25 = sshll.u32 (!%p141_p9), %s163_s20, 4  ;;  %s1484_s25 = int_to_ptr.vmem [resolvable:$true] %s900_s25 }
  0x12   : > { %s1179_s29 = scalar_lea.vmem (!%p141_p9), %s1484_s25, 1024 }
  0x13   : > { %p1180_p11 = scmp.ne.s32.totalorder (!%p141_p9), %s1484_s25, %s1179_s29 }
  0x15   : > { %s165_s28 = scalar_select %p164_p10, %s1287_s16, 1 }
  0x16   : > { %s1491_s16 = scalar_lea.sflag [#allocation3], %s161_s10  ;;  %p1181_p12 = pnand %p1180_p11, %p1304_p5 }
  0x17   : > { %s1125_s4 = smul.u32 72, %s165_s28  ;;  %s1482_s28 = scalar_lea.hbm %s1535_s3, %s1040_s24 }
  0x18   : > { %p1182_p13 = pneg %p1181_p12 }
  0x19   : > { %s1334_s9 = scalar_lea.vmem %s1532_s0, %s1125_s4  ;;  %s1183_s4 = sshll.u32 %s1243_s30, 4  ;;  %s1184_s4 = int_to_ptr.vmem [resolvable:$false] %s1183_s4 }
  0x1a   : > { %v1168_v4 = vld [vmem:[%s1334_s9 + $0x8] ss:$8 sps:$4 sm:$0xff]   ;;  %v1169_v5 = vld [vmem:[%s1334_s9 + $0x18] ss:$8 sps:$4 sm:$0xff]   ;;  %v180_v9 = vld [vmem:[%s1334_s9 + $0x4] sm:$0x1]  ;;  %p1186_p0 = scmp.lt.s32.totalorder %s1484_s25, %s1184_s4 }
  0x1b   : > { %1083 = vmatprep.mubr.msk.bf16.mxu0 %vm324_vm0, %v1168_v4  ;;  %v1171_v6 = vld [vmem:[%s1334_s9 + $0x28] ss:$8 sps:$4 sm:$0xff]   ;;  %v1342_v7 = vld [vmem:[%s1334_s9] sm:$0xf]  ;;  %v181_v10 = vld [vmem:[%s1334_s9 + $0xc] sm:$0x1] }
  0x1c   : > { %1084 = vmatmul.mubr.msk.bf16.vlgmr.msra.gmra.mrb[0].mxu0 %vm324_vm0, %v1169_v5  ;;  %v1345_v8 = vld [vmem:[%s1334_s9 + $0x8] sm:$0xf]  ;;  %v192_v11 = vshrl.u32 %v1342_v7, 16  ;;  %v195_v12 = vshll.u32 %v1342_v7, 16  ;;  %v201_v13 = vshll.u32 %v180_v9, 16  ;;  %v215_v16 = vshll.u32 %v181_v10, 16 }
  0x1d   : > { %1087 = vmatprep.mubr.msk.bf16.mxu0 %vm324_vm0, %v1171_v6  ;;  %v206_v14 = vshrl.u32 %v1345_v8, 16  ;;  %1092 = vmatpush3.bf16.msra.mxu0 %v1174_v3  ;;  %v209_v15 = vshll.u32 %v1345_v8, 16  ;;  %v1173_v21 = vld [vmem:[%s1334_s9 + $0x38] ss:$8 sps:$4 sm:$0xff]   ;;  %v1356_v24 = vld [vmem:[%s1334_s9 + $0x10] sm:$0xf] }
  0x1e   : > { %v194_v17 = vrot.slane %v192_v11, 4  ;;  %v197_v18 = vrot.slane %v195_v12, 5  ;;  %v203_v19 = vrot.slane %v201_v13, 5  ;;  %v217_v23 = vrot.slane %v215_v16, 5  ;;  %v1359_v25 = vld [vmem:[%s1334_s9 + $0x18] sm:$0xf] }
  0x1f   : > { %v208_v20 = vrot.slane %v206_v14, 4  ;;  %v211_v22 = vrot.slane %v209_v15, 5  ;;  %v182_v27 = vld [vmem:[%s1334_s9 + $0x14] sm:$0x1]  ;;  %v183_v28 = vld [vmem:[%s1334_s9 + $0x1c] sm:$0x1] }
  0x20   : > { %v198_v26 = vor.u32 %v197_v18, %v194_v17  ;;  %v220_v29 = vshrl.u32 %v1356_v24, 16  ;;  %v223_v30 = vshll.u32 %v1356_v24, 16  ;;  %v229_v33 = vshll.u32 %v182_v27, 16  ;;  %v1007_v36 = vld [vmem:[%s1334_s9 + $0x8] sm:$0xf]  ;;  %s1185_s5 = scalar_lea.vmem %s1184_s4, 2048 }
  0x21   : > { %v212_v32 = vor.u32 %v211_v22, %v208_v20  ;;  %v234_v34 = vshrl.u32 %v1359_v25, 16  ;;  %v237_v35 = vshll.u32 %v1359_v25, 16  ;;  %v243_v40 = vshll.u32 %v183_v28, 16  ;;  %v1008_v41 = vld [vmem:[%s1334_s9 + $0xc] sm:$0x1]  ;;  %p1187_p1 = scmp.lt.s32.totalorder %s1185_s5, %s1179_s29 }
  0x22   : > { %v199_v37 = vrot.slane %v198_v26, 4  ;;  %v222_v38 = vrot.slane %v220_v29, 4  ;;  %v225_v39 = vrot.slane %v223_v30, 5  ;;  %v231_v43 = vrot.slane %v229_v33, 5  ;;  %v1009_v46 = vld [vmem:[%s1334_s9 + $0x10] sm:$0xf] }
  0x23   : > { %v213_v42 = vrot.slane %v212_v32, 4  ;;  %v236_v44 = vrot.slane %v234_v34, 4  ;;  %v239_v45 = vrot.slane %v237_v35, 5  ;;  %v245_v49 = vrot.slane %v243_v40, 5  ;;  %v1010_v53 = vld [vmem:[%s1334_s9 + $0x14] sm:$0x1]  ;;  %p1188_p2 = por %p1187_p1, %p1186_p0 }
  0x24   : > { %1088 = vmatmul.mubr.msk.bf16.gmra.mrb[4].mxu0 %vm324_vm0, %v1173_v21  ;;  %v204_v47 = vsel %vm1367_vm3, %v199_v37, %v203_v19  ;;  %v226_v48 = vor.u32 %v225_v39, %v222_v38  ;;  %v645_v50 = vshrl.u32 %v1007_v36, 16  ;;  %v648_v54 = vshll.u32 %v1007_v36, 16  ;;  %v1383_v56 = vld [vmem:[%s1334_s9 + $0x20] sm:$0xf]  ;;  %v184_v1 = vld [vmem:[%s1334_s9 + $0x24] sm:$0x1] }
  0x25   : > { %v218_v51 = vsel %vm1367_vm3, %v213_v42, %v217_v23  ;;  %v240_v52 = vor.u32 %v239_v45, %v236_v44  ;;  %v654_v55 = vshll.u32 %v1008_v41, 16  ;;  %v659_v60 = vshrl.u32 %v1009_v46, 16  ;;  %v1390_v6 = vld [vmem:[%s1334_s9 + $0x28] sm:$0xf]  ;;  %v185_v13 = vld [vmem:[%s1334_s9 + $0x2c] sm:$0x1]  ;;  %p1189_p3 = pnand %p1188_p2, %p1182_p13 }
  0x26   : > { %v970_v57 = vcombine.low %v204_v47, %v218_v51  ;;  %v227_v58 = vrot.slane %v226_v48, 4  ;;  %v647_v59 = vrot.slane %v645_v50, 4  ;;  %v650_v62 = vrot.slane %v648_v54, 5  ;;  %v1011_v15 = vld [vmem:[%s1334_s9 + $0x18] sm:$0xf] }
  0x27   : > { %v241_v61 = vrot.slane %v240_v52, 4  ;;  %v656_v63 = vrot.slane %v654_v55, 5  ;;  %v662_v0 = vshll.u32 %v1009_v46, 16  ;;  %v661_v4 = vrot.slane %v659_v60, 4  ;;  %v1012_v26 = vld [vmem:[%s1334_s9 + $0x1c] sm:$0x1] }
  0x28   : > { %1063 = vmatprep.mubr.msk.bf16.mxu1 %vm324_vm0, %v970_v57  ;;  %v232_v3 = vsel %vm1367_vm3, %v227_v58, %v231_v43  ;;  %v668_v5 = vshll.u32 %v1010_v53, 16  ;;  %v248_v9 = vshrl.u32 %v1383_v56, 16  ;;  %v651_v11 = vor.u32 %v650_v62, %v647_v59  ;;  %v1013_v30 = vld [vmem:[%s1334_s9 + $0x20] sm:$0xf]  ;;  %v1014_v39 = vld [vmem:[%s1334_s9 + $0x24] sm:$0x1] }
  0x29   : > { %v246_v10 = vsel %vm1367_vm3, %v241_v61, %v245_v49  ;;  %v664_v12 = vrot.slane %v662_v0, 5  ;;  %v251_v14 = vshll.u32 %v1383_v56, 16  ;;  %v257_v19 = vshll.u32 %v184_v1, 16  ;;  %v1413_v50 = vld [vmem:[%s1334_s9 + $0x38] sm:$0xf] }
  0x2a   : > { %v971_v16 = vcombine.low %v232_v3, %v246_v10  ;;  %v670_v17 = vrot.slane %v668_v5, 5  ;;  %v250_v18 = vrot.slane %v248_v9, 4  ;;  %v652_v20 = vrot.slane %v651_v11, 4  ;;  %v186_v51 = vld [vmem:[%s1334_s9 + $0x34] sm:$0x1] }
  0x2b   : > { %v665_v21 = vor.u32 %v664_v12, %v661_v4  ;;  %v253_v22 = vrot.slane %v251_v14, 5  ;;  %v262_v23 = vshrl.u32 %v1390_v6, 16  ;;  %v259_v27 = vrot.slane %v257_v19, 5  ;;  %v187_v62 = vld [vmem:[%s1334_s9 + $0x3c] sm:$0x1] }
  0x2c   : > { %1064 = vmatmul.mubr.msk.bf16.vlgmr.msra.gmra.mrb[0].mxu1 %vm324_vm0, %v971_v16  ;;  %v265_v28 = vshll.u32 %v1390_v6, 16  ;;  %v271_v29 = vshll.u32 %v185_v13, 16  ;;  %v673_v32 = vshrl.u32 %v1011_v15, 16  ;;  %v657_v33 = vsel %vm1367_vm3, %v652_v20, %v656_v63  ;;  %v1015_v10 = vld [vmem:[%s1334_s9 + $0x28] sm:$0xf] }
  0x2d   : > { %1072 = vmatpush3.bf16.msra.mxu1 %v1325_v2  ;;  %v666_v34 = vrot.slane %v665_v21, 4  ;;  %v254_v35 = vor.u32 %v253_v22, %v250_v18  ;;  %v264_v36 = vrot.slane %v262_v23, 4  ;;  %v676_v41 = vshll.u32 %v1011_v15, 16  ;;  %v1410_v2 = vld [vmem:[%s1334_s9 + $0x30] sm:$0xf] }
  0x2e   : > { %v267_v37 = vrot.slane %v265_v28, 5  ;;  %v273_v38 = vrot.slane %v271_v29, 5  ;;  %v675_v40 = vrot.slane %v673_v32, 4  ;;  %v682_v44 = vshll.u32 %v1012_v26, 16  ;;  %v1016_v11 = vld [vmem:[%s1334_s9 + $0x2c] sm:$0x1] }
  0x2f   : > { %v671_v42 = vsel %vm1367_vm3, %v666_v34, %v670_v17  ;;  %v255_v43 = vrot.slane %v254_v35, 4  ;;  %v687_v45 = vshrl.u32 %v1013_v30, 16  ;;  %v678_v48 = vrot.slane %v676_v41, 5  ;;  %v1017_v15 = vld [vmem:[%s1334_s9 + $0x30] sm:$0xf] }
  0x30   : > { %v1025_v46 = vcombine.low %v657_v33, %v671_v42  ;;  %v268_v47 = vor.u32 %v267_v37, %v264_v36  ;;  %v690_v49 = vshll.u32 %v1013_v30, 16  ;;  %v684_v53 = vrot.slane %v682_v44, 5  ;;  %v1018_v22 = vld [vmem:[%s1334_s9 + $0x34] sm:$0x1]  ;;  %v1019_v30 = vld [vmem:[%s1334_s9 + $0x38] sm:$0xf] }
  0x31   : > { %v260_v52 = vsel %vm1367_vm3, %v255_v43, %v259_v27  ;;  %v689_v54 = vrot.slane %v687_v45, 4  ;;  %v696_v55 = vshll.u32 %v1014_v39, 16  ;;  %v679_v58 = vor.u32 %v678_v48, %v675_v40  ;;  %v1020_v36 = vld [vmem:[%s1334_s9 + $0x3c] sm:$0x1]  ;;  %v1021_v41 = vld [vmem:[%s1334_s9 + $0x40] sm:$0xf] }
  0x32   : > { %1093 = vmatprep.mubr.msk.bf16.mxu0 %vm324_vm0, %v1025_v46  ;;  %v269_v57 = vrot.slane %v268_v47, 4  ;;  %v692_v59 = vrot.slane %v690_v49, 5  ;;  %v276_v60 = vshrl.u32 %v1410_v2, 16  ;;  %v279_v63 = vshll.u32 %v1410_v2, 16 }
  0x33   : > { %v698_v61 = vrot.slane %v696_v55, 5  ;;  %v285_v0 = vshll.u32 %v186_v51, 16  ;;  %v290_v1 = vshrl.u32 %v1413_v50, 16  ;;  %v680_v4 = vrot.slane %v679_v58, 4 }
  0x34   : > { %v274_v3 = vsel %vm1367_vm3, %v269_v57, %v273_v38  ;;  %v693_v5 = vor.u32 %v692_v59, %v689_v54  ;;  %v278_v9 = vrot.slane %v276_v60, 4  ;;  %v281_v13 = vrot.slane %v279_v63, 5 }
  0x35   : > { %v972_v12 = vcombine.low %v260_v52, %v274_v3  ;;  %v292_v14 = vrot.slane %v290_v1, 4  ;;  %v979_v16 = vcombine.low %v1342_v7, %v1345_v8  ;;  %v685_v17 = vsel %vm1367_vm3, %v680_v4, %v684_v53  ;;  %v1022_v52 = vld [vmem:[%s1334_s9 + $0x44] sm:$0x1] }
  0x36   : > { %v694_v18 = vrot.slane %v693_v5, 4  ;;  %v293_v19 = vshll.u32 %v1413_v50, 16  ;;  %v299_v20 = vshll.u32 %v187_v62, 16  ;;  %v282_v21 = vor.u32 %v281_v13, %v278_v9 }
  0x37   : > { %1067 = vmatprep.mubr.msk.bf16.mxu1 %vm324_vm0, %v972_v12  ;;  %v701_v23 = vshrl.u32 %v1015_v10, 16  ;;  %v704_v26 = vshll.u32 %v1015_v10, 16  ;;  %v710_v27 = vshll.u32 %v1016_v11, 16  ;;  %v287_v7 = vrot.slane %v285_v0, 5 }
  0x38   : > { %v699_v28 = vsel %vm1367_vm3, %v694_v18, %v698_v61  ;;  %v295_v8 = vrot.slane %v293_v19, 5  ;;  %v715_v29 = vshrl.u32 %v1017_v15, 16  ;;  %v283_v33 = vrot.slane %v282_v21, 4 }
  0x39   : > { %v1026_v32 = vcombine.low %v685_v17, %v699_v28  ;;  %v703_v34 = vrot.slane %v701_v23, 4  ;;  %v706_v35 = vrot.slane %v704_v26, 5  ;;  %v301_v38 = vrot.slane %v299_v20, 5 }
  0x3a   : > { %v296_v37 = vor.u32 %v295_v8, %v292_v14  ;;  %v717_v39 = vrot.slane %v715_v29, 4  ;;  %v718_v40 = vshll.u32 %v1017_v15, 16  ;;  %v712_v43 = vrot.slane %v710_v27, 5 }
  0x3b   : > { %1094 = vmatmul.mubr.msk.bf16.vlgmr.msra.gmra.mrb[0].mxu0 %vm324_vm0, %v1026_v32  ;;  %v707_v42 = vor.u32 %v706_v35, %v703_v34  ;;  %v724_v44 = vshll.u32 %v1018_v22, 16  ;;  %v729_v45 = vshrl.u32 %v1019_v30, 16  ;;  %v288_v46 = vsel %vm1367_vm3, %v283_v33, %v287_v7 }
  0x3c   : > { %v297_v47 = vrot.slane %v296_v37, 4  ;;  %v720_v48 = vrot.slane %v718_v40, 5  ;;  %v732_v49 = vshll.u32 %v1019_v30, 16  ;;  %v738_v54 = vshll.u32 %v1020_v36, 16 }
  0x3d   : > { %v708_v51 = vrot.slane %v707_v42, 4  ;;  %v731_v53 = vrot.slane %v729_v45, 4  ;;  %v743_v55 = vshrl.u32 %v1021_v41, 16  ;;  %v726_v59 = vrot.slane %v724_v44, 5 }
  0x3e   : > { %v302_v57 = vsel %vm1367_vm3, %v297_v47, %v301_v38  ;;  %v721_v58 = vor.u32 %v720_v48, %v717_v39  ;;  %v734_v60 = vrot.slane %v732_v49, 5  ;;  %v746_v63 = vshll.u32 %v1021_v41, 16 }
  0x3f   : > { %v973_v61 = vcombine.low %v288_v46, %v302_v57  ;;  %v745_v62 = vrot.slane %v743_v55, 4  ;;  %v713_v0 = vsel %vm1367_vm3, %v708_v51, %v712_v43  ;;  %v752_v4 = vshll.u32 %v1022_v52, 16 }
  0x40   : > { %v722_v1 = vrot.slane %v721_v58, 4  ;;  %v735_v3 = vor.u32 %v734_v60, %v731_v53  ;;  %v740_v5 = vrot.slane %v738_v54, 5  ;;  %v748_v9 = vrot.slane %v746_v63, 5 }
  0x41   : > { %1068 = vmatmul.mubr.msk.bf16.gmra.mrb[4].mxu1 %vm324_vm0, %v973_v61  ;;  %v754_v14 = vrot.slane %v752_v4, 5  ;;  %v980_v18 = vcombine.low %v1356_v24, %v1359_v25  ;;  %v981_v19 = vcombine.low %v1383_v56, %v1390_v6  ;;  %v982_v21 = vcombine.low %v1410_v2, %v1413_v50  ;;  %v1034_v56 = vld [vmem:[%s1534_s2] ss:$0 sm:$0xff] }
  0x42   : > { %v727_v10 = vsel %vm1367_vm3, %v722_v1, %v726_v59  ;;  %1073 = vmatprep.mubr.msk.bf16.mxu1 %vm324_vm0, %v979_v16  ;;  %v736_v11 = vrot.slane %v735_v3, 4  ;;  %v749_v13 = vor.u32 %v748_v9, %v745_v62 }
  0x43   : > { %v1027_v12 = vcombine.low %v713_v0, %v727_v10 }
  0x44   : > { %v741_v15 = vsel %vm1367_vm3, %v736_v11, %v740_v5  ;;  %v750_v17 = vrot.slane %v749_v13, 4 }
  0x45   : > { %1097 = vmatprep.mubr.msk.bf16.mxu0 %vm324_vm0, %v1027_v12 }
  0x46   : > { %v755_v16 = vsel %vm1367_vm3, %v750_v17, %v754_v14 }
  0x47   : > { %v1028_v20 = vcombine.low %v741_v15, %v755_v16 }
  0x49   : > { %1074 = vmatmul.mubr.msk.bf16.vlgmr.msra.gmra.mrb[0].mxu1 %vm324_vm0, %v980_v18  ;;  %1098 = vmatmul.mubr.msk.bf16.gmra.mrb[4].mxu0 %vm324_vm0, %v1028_v20 }
  0x4a   : > { %1077 = vmatprep.mubr.msk.bf16.mxu1 %vm324_vm0, %v981_v19 }
  0x51   : > { %1078 = vmatmul.mubr.msk.bf16.gmra.mrb[4].mxu1 %vm324_vm0, %v982_v21 }
 0x10e   : > { %v1095_v22 = vpop.f32.mrb[0].mxu0 }
 0x10f   : > { %v823_v24 = vpop.f32.mrb[1].mxu0 }
 0x110   : > { %v1096_v25 = vpop.f32.mrb[2].mxu0 }
 0x111   : > { %v826_v23 = vpop.f32.mrb[3].mxu0 }
 0x11c   : > { %v1075_v31 = vpop.f32.mrb[0].mxu1  ;;  %v1099_v6 = vpop.f32.mrb[4].mxu0 }
 0x11d   : > { %v1101_v26 = vadd.f32 %v1095_v22, %v1075_v31  ;;  %v474_v27 = vpop.f32.mrb[1].mxu1  ;;  %v839_v28 = vpop.f32.mrb[5].mxu0 }
 0x11e   : > { %v1102_v2 = vadd.f32 %v823_v24, %v474_v27  ;;  %v1076_v50 = vpop.f32.mrb[2].mxu1  ;;  %v1100_v8 = vpop.f32.mrb[6].mxu0 }
 0x11f   : > { %v871_v7 = vadd.f32 %v1101_v26, %v1034_v56  ;;  %v1103_v29 = vadd.f32 %v1096_v25, %v1076_v50  ;;  %v477_v30 = vpop.f32.mrb[3].mxu1  ;;  %v842_v33 = vpop.f32.mrb[7].mxu0 }
 0x120   : > { %v869_v32 = vadd.f32 %v1102_v2, %v1034_v56  ;;  %v1104_v34 = vadd.f32 %v826_v23, %v477_v30 }
 0x121   : > { %880 = vst.msk [vmem:[%s163_s20 + $0x10] sm:$0xff] %vm877_vm4, %v871_v7  ;;  %v872_v35 = vadd.f32 %v1103_v29, %v1034_v56 }
 0x122   : > { %878 = vst.msk [vmem:[%s163_s20] sm:$0xff] %vm877_vm4, %v869_v32  ;;  %v870_v36 = vadd.f32 %v1104_v34, %v1034_v56 }
 0x123   : > { %881 = vst.msk [vmem:[%s163_s20 + $0x18] sm:$0xff] %vm877_vm4, %v872_v35 }
 0x124   : > { %879 = vst.msk [vmem:[%s163_s20 + $0x8] sm:$0xff] %vm877_vm4, %v870_v36  ;;  %v1079_v37 = vpop.f32.mrb[4].mxu1 }
 0x125   : > { %v1105_v38 = vadd.f32 %v1099_v6, %v1079_v37  ;;  %v490_v39 = vpop.f32.mrb[5].mxu1 }
 0x126   : > { %v1106_v40 = vadd.f32 %v839_v28, %v490_v39  ;;  %v1080_v41 = vpop.f32.mrb[6].mxu1 }
 0x127   : > { %v875_v42 = vadd.f32 %v1105_v38, %v1034_v56  ;;  %v1107_v43 = vadd.f32 %v1100_v8, %v1080_v41  ;;  %v493_v44 = vpop.f32.mrb[7].mxu1 }
 0x128   : > { %v873_v45 = vadd.f32 %v1106_v40, %v1034_v56  ;;  %v1108_v46 = vadd.f32 %v842_v33, %v493_v44 }
 0x129   : > { %884 = vst.msk [vmem:[%s163_s20 + $0x30] sm:$0xff] %vm877_vm4, %v875_v42  ;;  %v876_v47 = vadd.f32 %v1107_v43, %v1034_v56 }
 0x12a   : > { %882 = vst.msk [vmem:[%s163_s20 + $0x20] sm:$0xff] %vm877_vm4, %v873_v45  ;;  %v874_v48 = vadd.f32 %v1108_v46, %v1034_v56 }
 0x12b   : > { %885 = vst.msk [vmem:[%s163_s20 + $0x38] sm:$0xff] %vm877_vm4, %v876_v47 }
 0x12c   : > { %883 = vst.msk [vmem:[%s163_s20 + $0x28] sm:$0xff] %vm877_vm4, %v874_v48 }
 0x12d   : > { %1192 = shalt.err (!%p1189_p3)
}
 0x12e   : > { %s1193_s6 = scalar_lea.hbm %s1482_s28, 1024  ;;  %s1197_s9 = scalar_lea.hbm %s1535_s3, 2048 }
 0x12f   : > { %p1194_p4 = scmp.ne.s32.totalorder %s1482_s28, %s1193_s6  ;;  %p1198_p9 = scmp.lt.u32.totalorder %s1482_s28, %s1535_s3 }
 0x130   : > { %p1199_p10 = scmp.lt.u32.totalorder %s1197_s9, %s1193_s6  ;;  %p1201_p12 = scmp.lt.u32.totalorder %s1193_s6, %s1482_s28 }
 0x131   : > { %p1195_p7 = pnand %p1194_p4, %p1304_p5 }
 0x132   : > { %p1200_p11 = por %p1199_p10, %p1198_p9 }
 0x133   : > { %p1196_p8 = pneg %p1195_p7 }
 0x134   : > { %p1202_p13 = por %p1201_p12, %p1200_p11 }
 0x136   : > { %p1203_p0 = pnand %p1202_p13, %p1196_p8 }
 0x138   : > { %1206 = shalt.err (!%p1203_p0)
}
 0x139   : > { %s1244_s17 = smov 128   ;;  %s1245_s19 = smov 8  }
 0x13a   : > { %1126 = dma.vmem_to_hbm [thread:$0]  (%p1304_p5), %s1484_s25, 1024, %s1482_s28, %s1491_s16, %s1244_s17, %s1244_s17, %s1245_s19  }
 0x13b PF: > { %p1132_p1 = scmp.ge.s32.totalorder %s1241_s15, 2  ;;  %s915_s20 = sand.u32 1, %s1229_s12  }
 0x13c   : > { %s916_s24 = scalar_lea.sflag [#allocation3], %s915_s20 }
 0x13d   : > { %p1129_p2 = pnand %p1132_p1, %p1308_p6 }
 0x13f   : > { %1224 = dma.done.wait (!%p1129_p2), %s916_s24, 1024  }
 0x140   : > { %1226 = vsyncadd (!%p1129_p2), %s916_s24, 4294966272  ;;  %p13_p3 = scmp.ge.s32.totalorder %s1291_s18, 4   ;;  %s1540_s12 = smov %s1233_s13 }
 0x141   : > { %s1541_s13 = smov %s1237_s14  ;;  %s1542_s14 = smov %s1302_s21 }
 0x142   : > { %s1543_s15 = smov %s1291_s18  ;;  %15 = sbr.rel (!%p13_p3) target bundleno = 3 (0x3), region = 71 }
 0x149   :  { %921 = vsyncpa [#allocation3], 1 }
 0x14a   :  { %923 = vsyncpa [#allocation3 + $0x1], 1 }

</bundles_post_ra>
